<compile_context>
chip_gen: v7x
topology: tpu7x:2x2x1
jax: 0.10.0
libtpu: 0.0.40
codegen_flags: <defaults>
</compile_context>

<pallas_src>
from functools import reduce
import operator
from typing import Tuple, Union

import jax
import jax.numpy as jnp
from jax.experimental import pallas as pl
from jax.experimental.pallas import tpu as pltpu


_TARGET_BLOCK_BYTES = 4 * 1024 * 1024    # ~4 MiB per tile (per array)
_VMEM_LIMIT_BYTES = 32 * 1024 * 1024     # explicit: > v5e 16 MiB default, < v7x 64 MiB phys


def _copy_kernel(x_ref, o_ref):
    # Identity copy of one lane-dense (block_rows, lanes) tile (unmasked vst's).
    o_ref[...] = x_ref[...]


def _sublane_for_itemsize(itemsize: int) -> int:
    # Sublane tile height per dtype width (f32:8, bf16:16, int8/fp8:32).
    return {4: 8, 2: 16, 1: 32}.get(itemsize, 8)


def _choose_slab(total: int, itemsize: int) -> Tuple[int, int, int]:
    """Pick (rows, lanes, padded_total) with lanes % 128 == 0 and rows % sublane == 0.

    Prefers a factorization of `total` (no padding); otherwise pads up to a
    multiple of lanes*sublane so tiling/pipelining is always possible.
    """
    sublane = _sublane_for_itemsize(itemsize)
    for lanes in (2048, 1024, 512, 256, 128):
        if total % (lanes * sublane) == 0:
            return total // lanes, lanes, total
    lanes = 512
    unit = lanes * sublane
    padded = ((total + unit - 1) // unit) * unit
    return padded // lanes, lanes, padded


def _pallas_identity_copy(x: jax.Array) -> jax.Array:
    """Materialized identity copy of `x` via a tiled, lane-dense Pallas memcpy.

    Returns a flat 1-D array with `x`'s elements in row-major order; the caller
    reshapes it to the target shape.
    """
    dtype = x.dtype
    itemsize = jnp.dtype(dtype).itemsize
    total = reduce(operator.mul, x.shape, 1)
    sublane = _sublane_for_itemsize(itemsize)

    rows, lanes, padded_total = _choose_slab(total, itemsize)
    flat = jnp.reshape(x, (total,))
    if padded_total != total:
        flat = jnp.pad(flat, (0, padded_total - total))
    slab = jnp.reshape(flat, (rows, lanes))

    # --- Block sizing by byte budget (rows kept a multiple of the sublane tile).
    rows_budget = max(_TARGET_BLOCK_BYTES // (lanes * itemsize), sublane)
    block_rows = min(rows, (rows_budget // sublane) * sublane)
    block_rows = max(block_rows, sublane)

    # v7x has 2 TensorCores: give the parallel row axis >= 2 grid steps when possible.
    grid_rows = (rows + block_rows - 1) // block_rows
    if grid_rows < 2 and rows >= 2 * sublane:
        half = rows // 2
        block_rows = max(sublane, (half // sublane) * sublane)
        grid_rows = (rows + block_rows - 1) // block_rows

    cost = pl.CostEstimate(
        flops=0,
        transcendentals=0,
        bytes_accessed=2 * padded_total * itemsize,  # read + write
    )

    copied = pl.pallas_call(
        _copy_kernel,
        out_shape=jax.ShapeDtypeStruct((rows, lanes), dtype),
        grid=(grid_rows,),
        in_specs=[pl.BlockSpec((block_rows, lanes), lambda i: (i, 0))],
        out_specs=pl.BlockSpec((block_rows, lanes), lambda i: (i, 0)),
        compiler_params=pltpu.CompilerParams(
            dimension_semantics=("parallel",),
            vmem_limit_bytes=_VMEM_LIMIT_BYTES,
        ),
        cost_estimate=cost,
    )(slab)

    out_flat = jnp.reshape(copied, (padded_total,))
    if padded_total != total:
        out_flat = out_flat[:total]
    return out_flat


def view_pallas(
    x: jax.Array,
    shape: Union[Tuple[int, ...], int],
    *,
    materialize: bool = False,
) -> jax.Array:
    """Reproduces View(shape).forward(x): keep batch dim, reshape the rest.

    Default path is a zero-copy reshape (metadata only — the optimal TPU
    implementation of torch .view()).  Pass materialize=True to force an
    explicit HBM copy through the tiled Pallas memcpy.
    """
    batch_size = x.shape[0]
    if isinstance(shape, tuple):
        out_shape = (batch_size, *shape)
    elif isinstance(shape, int):
        out_shape = (batch_size, shape)
    else:
        raise TypeError(f"invalid shape type: {type(shape)}")

    in_elems = reduce(operator.mul, x.shape, 1)
    out_elems = reduce(operator.mul, out_shape, 1)
    assert in_elems == out_elems, f"cannot view {x.shape} as {out_shape}"

    if not materialize:
        return jnp.reshape(x, out_shape)

    return jnp.reshape(_pallas_identity_copy(x), out_shape)


if __name__ == "__main__":
    key = jax.random.PRNGKey(0)

    # Small NCHW input consistent with a typical conv feature map.
    B, C, H, W = 2, 4, 16, 16
    x = jax.random.normal(key, (B, C, H, W), dtype=jnp.float32)

    ref_flat = jnp.reshape(x, (B, -1))
    ref_tup = jnp.reshape(x, (B, C, H * W))

    # --- Default (zero-copy) path -------------------------------------------
    out_flat = jax.block_until_ready(view_pallas(x, C * H * W))
    assert out_flat.shape == (B, C * H * W)
    assert jnp.array_equal(out_flat, ref_flat)

    out_tup = jax.block_until_ready(view_pallas(x, (C, H * W)))
    assert out_tup.shape == (B, C, H * W)
    assert jnp.array_equal(out_tup, ref_tup)

    # --- Explicit materialized Pallas copy path ------------------------------
    out_flat_m = jax.block_until_ready(view_pallas(x, C * H * W, materialize=True))
    assert out_flat_m.shape == (B, C * H * W)
    assert jnp.array_equal(out_flat_m, ref_flat)

    out_tup_m = jax.block_until_ready(view_pallas(x, (C, H * W), materialize=True))
    assert out_tup_m.shape == (B, C, H * W)
    assert jnp.array_equal(out_tup_m, ref_tup)

    # bf16 (16-sublane tile) materialized copy.
    x_bf16 = x.astype(jnp.bfloat16)
    out_bf16 = jax.block_until_ready(view_pallas(x_bf16, C * H * W, materialize=True))
    assert jnp.array_equal(out_bf16, jnp.reshape(x_bf16, (B, -1)))

    # Non-128-divisible total: exercises the pad-and-tile fallback path.
    x_odd = jax.random.normal(jax.random.PRNGKey(1), (2, 3, 5, 7), dtype=jnp.float32)
    ref_odd = jnp.reshape(x_odd, (2, 3, 35))
    out_odd = jax.block_until_ready(view_pallas(x_odd, (3, 35), materialize=True))
    assert out_odd.shape == (2, 3, 35)
    assert jnp.array_equal(out_odd, ref_odd)

    print("KERNEL_OK")
</pallas_src>

<mosaic_0001>
module attributes {stable_mosaic.version = 11 : i64} {
  func.func @_copy_kernel(%arg0: i32, %arg1: memref<8x256xf32, #tpu.memory_space<vmem>>, %arg2: memref<8x256xf32, #tpu.memory_space<vmem>>) attributes {dimension_semantics = [#tpu.dimension_semantics<parallel>], iteration_bounds = array<i64: 1>, scalar_prefetch = 0 : i64, scratch_operands = 0 : i64, tpu.core_type = #tpu.core_type<tc>, window_params = [{transform_indices = @transform_0, window_bounds = array<i64: 8, 256>}, {transform_indices = @transform_1, window_bounds = array<i64: 8, 256>}]} {
    %c0 = arith.constant 0 : index
    %c0_0 = arith.constant 0 : index
    %0 = vector.load %arg1[%c0, %c0_0] : memref<8x256xf32, #tpu.memory_space<vmem>>, vector<8x256xf32>
    %c0_1 = arith.constant 0 : index
    %c0_2 = arith.constant 0 : index
    %1 = vector.load %arg2[%c0_1, %c0_2] : memref<8x256xf32, #tpu.memory_space<vmem>>, vector<8x256xf32>
    tpu.vector_store %arg2[%c0_1, %c0_2], %0 {strides = array<i32>} : memref<8x256xf32, #tpu.memory_space<vmem>>, vector<8x256xf32>,
    return
  }
  func.func @transform_0(%arg0: i32) -> (i32, i32) {
    %c0_i32 = arith.constant 0 : i32
    %c0_i32_0 = arith.constant 0 : i32
    return %arg0, %c0_i32 : i32, i32
  }
  func.func @transform_1(%arg0: i32) -> (i32, i32) {
    %c0_i32 = arith.constant 0 : i32
    %c0_i32_0 = arith.constant 0 : i32
    return %arg0, %c0_i32 : i32, i32
  }
}

</mosaic_0001>

<bundles_post_ra>
// kernel: tpu_custom_call.1
= control target key start
LH: loop header
LB: loop body
LE: loop exit
PB: predicated region body
PF: predicated region fallthrough
CT: control target
= control target key end

     0   :  { %6 = vsyncpa [#allocation3], 0  ;;  %s126_s0 = inlined_call_operand.hbm [shape: f32[8,256], index: 0, kind: input, shape index: {}]   ;;  %s127_s1 = inlined_call_operand.hbm [shape: f32[8,256], index: 1, kind: output, shape index: {}]  }
   0x1   :  { %7 = vsyncpa [#allocation4], 0  ;;  %s90_s6 = smov [#allocation2]   ;;  %s42_s10 = scalar_lea.hbm %s126_s0, 256 }
   0x2   :  { %s14_s7 = sshll.u32 %s90_s6, 4  ;;  %p43_p0 = scmp.ne.s32.totalorder %s126_s0, %s42_s10  ;;  %s15_s7 = int_to_ptr.vmem [resolvable:$true] %s14_s7 }
   0x3   :  { %p46_p1 = scmp.lt.u32.totalorder %s42_s10, %s126_s0 }
   0x5   :  { %p48_p2 = pnand %p46_p1, %p43_p0 }
   0x7   :  { %51 = shalt.err (!%p48_p2)
}
   0x8   :  { %s52_s15 = scalar_lea.vmem %s15_s7, 256  ;;  %p57_p4 = scmp.lt.s32.totalorder %s15_s7, %s15_s7 }
   0x9   :  { %p53_p3 = scmp.ne.s32.totalorder %s15_s7, %s52_s15  ;;  %p58_p5 = scmp.lt.s32.totalorder %s52_s15, %s52_s15 }
   0xb   :  { %p59_p6 = por %p58_p5, %p57_p4 }
   0xd   :  { %p60_p7 = pnand %p59_p6, %p53_p3 }
   0xf   :  { %63 = shalt.err (!%p60_p7)
}
  0x10   :  { %17 = dma.hbm_to_vmem [thread:$0]  %s126_s0, 256, %s15_s7, [#allocation3]  }
  0x11   :  { %86 = dma.done.wait [#allocation3], 256  }
  0x12   :  { %87 = vsyncadd [#allocation3], 4294967040  ;;  %s91_s18 = smov [#allocation5]   ;;  %v21_v0 = vld [vmem:[#allocation2] sm:$0xff]  ;;  %v22_v1 = vld [vmem:[#allocation2 + $0x8] sm:$0xff] }
  0x13   :  { %s31_s19 = sshll.u32 %s91_s18, 4  ;;  %23 = vst [vmem:[#allocation5] sm:$0xff] %v21_v0  ;;  %24 = vst [vmem:[#allocation5 + $0x8] sm:$0xff] %v22_v1  ;;  %s32_s19 = int_to_ptr.vmem [resolvable:$true] %s31_s19 }
  0x14   :  { %s64_s20 = scalar_lea.vmem %s32_s19, 256  ;;  %p69_p9 = scmp.lt.s32.totalorder %s32_s19, %s32_s19 }
  0x15   :  { %p65_p8 = scmp.ne.s32.totalorder %s32_s19, %s64_s20  ;;  %p70_p10 = scmp.lt.s32.totalorder %s64_s20, %s64_s20 }
  0x17   :  { %p71_p11 = por %p70_p10, %p69_p9 }
  0x19   :  { %p72_p12 = pnand %p71_p11, %p65_p8 }
  0x1b   :  { %75 = shalt.err (!%p72_p12)
}
  0x1c   :  { %s76_s0 = scalar_lea.hbm %s127_s1, 256 }
  0x1d   :  { %p77_p13 = scmp.ne.s32.totalorder %s127_s1, %s76_s0  ;;  %p80_p0 = scmp.lt.u32.totalorder %s76_s0, %s127_s1 }
  0x1f   :  { %p82_p1 = pnand %p80_p0, %p77_p13 }
  0x21   :  { %85 = shalt.err (!%p82_p1)
}
  0x22   :  { %34 = dma.vmem_to_hbm [thread:$0]  %s32_s19, 256, %s127_s1, [#allocation4]  }
  0x23   :  { %88 = dma.done.wait [#allocation4], 256  }
  0x24   :  { %89 = vsyncadd [#allocation4], 4294967040 }
  0x25   :  { %38 = vsyncpa [#allocation3], 1 }
  0x26   :  { %39 = vsyncpa [#allocation4], 1 }

</bundles_post_ra>
